<compile_context>
chip_gen: v6e
topology: v6e:2x2x1
jax: 0.10.0
libtpu: 0.0.40
codegen_flags: <defaults>
</compile_context>

<pallas_src>
import functools

import jax
import jax.numpy as jnp
from jax.experimental import pallas as pl
from jax.experimental.pallas import tpu as pltpu


def _swish_kernel(x_ref, o_ref, *, beta):
    # x_ref / o_ref: (tile_rows, 128) VMEM tiles. Compute in f32, store in
    # the output dtype (explicit cast -> well-defined for bf16/fp16 inputs).
    x = x_ref[...].astype(jnp.float32)
    y = x * jax.nn.sigmoid(beta * x)
    o_ref[...] = y.astype(o_ref.dtype)


def swish_pallas(x, beta=1.0, *, tile_rows=4096):
    """Swish / SiLU with scalar beta, computed in a Pallas TPU kernel.

    x: any-shaped float array (e.g. NCHW). Returns same shape & dtype.
    beta: static Python float (module default trainable_beta=False).
    """
    orig_shape = x.shape
    n = x.size

    LANES = 128
    rows = pl.cdiv(n, LANES)            # number of 128-wide rows
    n_rows_elems = rows * LANES

    x_flat = jnp.ravel(x)               # free for contiguous input
    needs_pad = n_rows_elems != n
    if needs_pad:
        # Only pad when the element count is not 128-aligned (rare for conv
        # feature maps). swish(0) == 0, and the tail is sliced off below.
        x_flat = jnp.pad(x_flat, (0, n_rows_elems - n))
    x2d = x_flat.reshape(rows, LANES)   # free metadata reshape

    # Block: up to tile_rows x 128 f32 = 2 MiB. For small inputs use the whole
    # row extent as a single block (block_shape == full dim is always legal);
    # otherwise tile_rows (multiple of 8) with a masked partial last block.
    tr = rows if rows <= tile_rows else tile_rows
    grid = (pl.cdiv(rows, tr),)

    kernel = functools.partial(_swish_kernel, beta=float(beta))

    out2d = pl.pallas_call(
        kernel,
        out_shape=jax.ShapeDtypeStruct((rows, LANES), x2d.dtype),
        grid_spec=pl.GridSpec(
            grid=grid,
            in_specs=[pl.BlockSpec((tr, LANES), lambda i: (i, 0))],
            out_specs=pl.BlockSpec((tr, LANES), lambda i: (i, 0)),
        ),
        compiler_params=pltpu.CompilerParams(
            dimension_semantics=("parallel",),
            # in+out double-buffered = 4 x 2 MiB = 8 MiB; 32 MiB is explicit
            # and safe on v5e (128 MiB phys), v6e (128 MiB), v7x (64 MiB).
            vmem_limit_bytes=32 * 1024 * 1024,
        ),
    )(x2d)

    out_flat = out2d.reshape(-1)
    if needs_pad:
        out_flat = out_flat[:n]
    return out_flat.reshape(orig_shape)


if __name__ == "__main__":
    key = jax.random.PRNGKey(0)
    # Small NCHW input consistent with the conv-style usage in the Res-VAE.
    x = jax.random.normal(key, (2, 4, 16, 16), dtype=jnp.float32)

    # Module default: trainable_beta=False, initial_beta=1.0.
    beta = 1.0

    y = swish_pallas(x, beta)
    jax.block_until_ready(y)

    # correctness check against pure-JAX reference
    y_ref = x * jax.nn.sigmoid(beta * x)
    assert y.shape == x.shape and y.dtype == x.dtype
    assert jnp.max(jnp.abs(y - y_ref)) < 1e-6

    # bf16 path sanity check (explicit f32 compute + cast-back in kernel)
    xb = x.astype(jnp.bfloat16)
    yb = swish_pallas(xb, beta)
    jax.block_until_ready(yb)
    assert yb.dtype == jnp.bfloat16 and yb.shape == xb.shape

    print("KERNEL_OK")
</pallas_src>

<mosaic_0001>
module attributes {stable_mosaic.version = 11 : i64} {
  func.func @_swish_kernel(%arg0: i32, %arg1: memref<16x128xf32, #tpu.memory_space<vmem>>, %arg2: memref<16x128xf32, #tpu.memory_space<vmem>>) attributes {dimension_semantics = [#tpu.dimension_semantics<parallel>], iteration_bounds = array<i64: 1>, scalar_prefetch = 0 : i64, scratch_operands = 0 : i64, tpu.core_type = #tpu.core_type<tc>, window_params = [{transform_indices = @transform_0, window_bounds = array<i64: 16, 128>}, {transform_indices = @transform_1, window_bounds = array<i64: 16, 128>}]} {
    %c0 = arith.constant 0 : index
    %c0_0 = arith.constant 0 : index
    %0 = vector.load %arg1[%c0, %c0_0] : memref<16x128xf32, #tpu.memory_space<vmem>>, vector<16x128xf32>
    %cst = arith.constant 1.000000e+00 : f32
    %1 = vector.broadcast %cst : f32 to vector<16x128xf32>
    %2 = arith.mulf %1, %0 : vector<16x128xf32>
    %3 = arith.negf %2 : vector<16x128xf32>
    %4 = math.exp %3 : vector<16x128xf32>
    %cst_1 = arith.constant 1.000000e+00 : f32
    %5 = vector.broadcast %cst_1 : f32 to vector<16x128xf32>
    %6 = arith.addf %5, %4 : vector<16x128xf32>
    %7 = arith.divf %5, %6 : vector<16x128xf32>
    %8 = arith.mulf %0, %7 : vector<16x128xf32>
    %c0_2 = arith.constant 0 : index
    %c0_3 = arith.constant 0 : index
    %9 = vector.load %arg2[%c0_2, %c0_3] : memref<16x128xf32, #tpu.memory_space<vmem>>, vector<16x128xf32>
    tpu.vector_store %arg2[%c0_2, %c0_3], %8 {strides = array<i32>} : memref<16x128xf32, #tpu.memory_space<vmem>>, vector<16x128xf32>,
    return
  }
  func.func @transform_0(%arg0: i32) -> (i32, i32) {
    %c0_i32 = arith.constant 0 : i32
    %c0_i32_0 = arith.constant 0 : i32
    return %arg0, %c0_i32 : i32, i32
  }
  func.func @transform_1(%arg0: i32) -> (i32, i32) {
    %c0_i32 = arith.constant 0 : i32
    %c0_i32_0 = arith.constant 0 : i32
    return %arg0, %c0_i32 : i32, i32
  }
}

</mosaic_0001>

<bundles_post_ra>
// kernel: tpu_custom_call.1
= control target key start
LH: loop header
LB: loop body
LE: loop exit
PB: predicated region body
PF: predicated region fallthrough
CT: control target
= control target key end

     0   :  { %6 = vsyncpa [#allocation3], 0  ;;  %s142_s0 = inlined_call_operand.hbm [shape: f32[16,128], index: 0, kind: input, shape index: {}]   ;;  %s143_s1 = inlined_call_operand.hbm [shape: f32[16,128], index: 1, kind: output, shape index: {}]  }
   0x1   :  { %7 = vsyncpa [#allocation4], 0  ;;  %s116_s6 = smov [#allocation2]  }
   0x2   :  { %s13_s7 = sshll.u32 %s116_s6, 4  ;;  %s14_s7 = int_to_ptr.vmem [resolvable:$true] %s13_s7 }
   0x3   :  { %s80_s8 = scalar_lea.vmem %s14_s7, 256  ;;  %p85_p1 = scmp.lt.s32.totalorder %s14_s7, %s14_s7 }
   0x4   :  { %p81_p0 = scmp.ne.s32.totalorder %s14_s7, %s80_s8  ;;  %p86_p2 = scmp.lt.s32.totalorder %s80_s8, %s80_s8 }
   0x6   :  { %p87_p3 = por %p86_p2, %p85_p1 }
   0x8   :  { %p88_p4 = pnand %p87_p3, %p81_p0 }
   0xa   :  { %91 = shalt.err (!%p88_p4)
}
   0xb   :  { %s117_s9 = smov 128   ;;  %s118_s10 = smov 8  }
   0xc   :  { %19 = dma.hbm_to_vmem [thread:$0]  %s142_s0, 256, %s14_s7, [#allocation3], %s117_s9, %s117_s9, %s118_s10  }
   0xd   :  { %112 = dma.done.wait [#allocation3], 256  }
   0xe   :  { %113 = vsyncadd [#allocation3], 4294967040  ;;  %v23_v0 = vld [vmem:[#allocation2] sm:$0xff]  ;;  %v24_v1 = vld [vmem:[#allocation2 + $0x8] sm:$0xff]  ;;  %s119_s13 = smov [#allocation5]  }
   0xf   :  { %v58_v2 = vmul.f32 -1.442695, %v23_v0  ;;  %v59_v3 = vmul.f32 -1.442695, %v24_v1  ;;  %s46_s14 = sshll.u32 %s119_s13, 4  ;;  %s47_s14 = int_to_ptr.vmem [resolvable:$true] %s46_s14 }
  0x10   :  { %s92_s0 = scalar_lea.vmem %s47_s14, 256  ;;  %p97_p6 = scmp.lt.s32.totalorder %s47_s14, %s47_s14 }
  0x11   :  { %64 = vpow2.f32 %v58_v2  ;;  %p93_p5 = scmp.ne.s32.totalorder %s47_s14, %s92_s0  ;;  %p98_p7 = scmp.lt.s32.totalorder %s92_s0, %s92_s0 }
  0x12   :  { %66 = vpow2.f32 %v59_v3 }
  0x13   :  { %p99_p8 = por %p98_p7, %p97_p6 }
  0x15   :  { %p100_p9 = pnand %p99_p8, %p93_p5 }
  0x1e   :  { %v65_v4 = vpop.eup %64 }
  0x1f   :  { %v67_v5 = vpop.eup %66  ;;  %v31_v6 = vadd.f32 1.0, %v65_v4 }
  0x20   :  { %v32_v7 = vadd.f32 1.0, %v67_v5 }
  0x21   :  { %68 = vrcp.f32 %v31_v6 }
  0x22   :  { %70 = vrcp.f32 %v32_v7 }
  0x2e   :  { %v69_v8 = vpop.eup %68 }
  0x2f   :  { %v71_v9 = vpop.eup %70  ;;  %v37_v10 = vmul.f32 %v69_v8, %v23_v0 }
  0x30   :  { %v38_v11 = vmul.f32 %v71_v9, %v24_v1 }
  0x31   :  { %39 = vst [vmem:[#allocation5] sm:$0xff] %v37_v10 }
  0x32   :  { %40 = vst [vmem:[#allocation5 + $0x8] sm:$0xff] %v38_v11 }
  0x33   :  { %103 = shalt.err (!%p100_p9)
}
  0x34   :  { %52 = dma.vmem_to_hbm [thread:$0]  %s47_s14, 256, %s143_s1, [#allocation4], %s117_s9, %s117_s9, %s118_s10  }
  0x35   :  { %114 = dma.done.wait [#allocation4], 256  }
  0x36   :  { %115 = vsyncadd [#allocation4], 4294967040 }
  0x37   :  { %56 = vsyncpa [#allocation3], 1 }
  0x38   :  { %57 = vsyncpa [#allocation4], 1 }

</bundles_post_ra>
